<compile_context>
chip_gen: v7x
topology: tpu7x:2x2x1
jax: 0.10.0
libtpu: 0.0.40
codegen_flags: <defaults>
</compile_context>

<pallas_src>
import math

import jax
import jax.numpy as jnp
from jax import lax
from jax.experimental import pallas as pl
from jax.experimental.pallas import tpu as pltpu


def _dot_t(a, b):
    """a @ b.T without an explicit transpose (contract on b's second axis)."""
    return lax.dot_general(a, b, (((1,), (1,)), ((), ())),
                           preferred_element_type=jnp.float32)


# ------------------------------------------------------------------
# Fused kernel: QKV projection + attention + output projection (all heads)
# ------------------------------------------------------------------
def _make_self_attn_kernel(H, D, has_mask, compute_dtype):
    inv_scale = 1.0 / math.sqrt(float(D))

    def kernel(x_ref, wqkv_ref, wo_ref, b_ref, *rest):
        if has_mask:
            mask_ref, o_ref = rest
        else:
            (o_ref,) = rest

        x = x_ref[0]                          # (S, D)  compute_dtype
        bias = b_ref[...]                     # (1, D)  f32
        S = x.shape[0]
        acc = jnp.zeros((S, D), jnp.float32)

        if has_mask:
            mask_ok = mask_ref[...].astype(jnp.float32) > 0.0   # hoisted

        for h in range(H):                    # static unroll over heads
            w_h = wqkv_ref[h]                 # (3D, D) stacked [wq; wk; wv]
            # Single fused QKV matmul:  x @ [wq; wk; wv]^T  ->  (S, 3D), f32
            qkv = _dot_t(x, w_h)
            qp = (qkv[:, 0:D] * inv_scale).astype(compute_dtype)
            kp = qkv[:, D:2 * D].astype(compute_dtype)
            vp = qkv[:, 2 * D:3 * D].astype(compute_dtype)

            att = _dot_t(qp, kp)              # (S, S) f32, already scaled
            if has_mask:
                att = jnp.where(mask_ok, att, jnp.float32(-1e30))

            att_max = jnp.max(att, axis=-1, keepdims=True)
            p = jnp.exp(att - att_max)                       # f32 softmax
            denom = jnp.sum(p, axis=-1, keepdims=True)

            ctx = jnp.dot(p.astype(compute_dtype), vp,
                          preferred_element_type=jnp.float32)  # (S, D)
            # Fold normalization into the (S, D) context, not the (S, S) probs.
            ctx = ctx * pl.reciprocal(denom, approx=True)

            # Fused output projection: this head's slice of wo, accumulated.
            acc = acc + _dot_t(ctx.astype(compute_dtype), wo_ref[h])

        o_ref[0] = (acc + bias).astype(o_ref.dtype)

    return kernel


def _make_cross_attn_kernel(H, D, has_mask, compute_dtype):
    inv_scale = 1.0 / math.sqrt(float(D))

    def kernel(q_ref, k_ref, v_ref, wqkv_ref, wo_ref, b_ref, *rest):
        if has_mask:
            mask_ref, o_ref = rest
        else:
            (o_ref,) = rest

        q = q_ref[0]                          # (Sq, D)
        k = k_ref[0]                          # (Sk, D)
        v = v_ref[0]                          # (Sk, D)
        bias = b_ref[...]                     # (1, D)
        acc = jnp.zeros((q.shape[0], D), jnp.float32)

        if has_mask:
            mask_ok = mask_ref[...].astype(jnp.float32) > 0.0

        for h in range(H):
            w_h = wqkv_ref[h]                 # (3D, D)
            qp = (_dot_t(q, w_h[0:D]) * inv_scale).astype(compute_dtype)
            kp = _dot_t(k, w_h[D:2 * D]).astype(compute_dtype)
            vp = _dot_t(v, w_h[2 * D:3 * D]).astype(compute_dtype)

            att = _dot_t(qp, kp)              # (Sq, Sk) f32
            if has_mask:
                att = jnp.where(mask_ok, att, jnp.float32(-1e30))

            att_max = jnp.max(att, axis=-1, keepdims=True)
            p = jnp.exp(att - att_max)
            denom = jnp.sum(p, axis=-1, keepdims=True)

            ctx = jnp.dot(p.astype(compute_dtype), vp,
                          preferred_element_type=jnp.float32)
            ctx = ctx * pl.reciprocal(denom, approx=True)

            acc = acc + _dot_t(ctx.astype(compute_dtype), wo_ref[h])

        o_ref[0] = (acc + bias).astype(o_ref.dtype)

    return kernel


# ------------------------------------------------------------------
# Python wrapper reproducing MultiHead.forward
# ------------------------------------------------------------------
def multi_head_forward(q, k, v, params, mask=None, compute_dtype=jnp.bfloat16):
    """q, k, v: (B, S, D) float32 (k/v may be None -> self attention)."""
    self_attn = (k is None) and (v is None)
    if k is None:
        k = q
    if v is None:
        v = q

    B, S, D = q.shape
    S_k = k.shape[1]
    H = params["wq"].shape[0]

    # One stacked QKV weight (single array, single resident VMEM copy).
    wqkv = jnp.concatenate(
        [params["wq"], params["wk"], params["wv"]], axis=1
    ).astype(compute_dtype)                                  # (H, 3D, D)
    # Per-head slices of wo:  wo_heads[h] == wo[:, h*D:(h+1)*D]
    wo_heads = params["wo"].reshape(D, H, D).transpose(1, 0, 2).astype(compute_dtype)
    bias = params["bo"].reshape(1, D).astype(jnp.float32)

    has_mask = mask is not None

    wqkv_spec = pl.BlockSpec((H, 3 * D, D), lambda b: (0, 0, 0))
    wo_spec = pl.BlockSpec((H, D, D), lambda b: (0, 0, 0))
    bias_spec = pl.BlockSpec((1, D), lambda b: (0, 0))
    out_spec = pl.BlockSpec((1, S, D), lambda b: (b, 0, 0))

    in_arrays = []
    in_specs = []
    if self_attn:
        kern = _make_self_attn_kernel(H, D, has_mask, compute_dtype)
        in_arrays.append(q.astype(compute_dtype))
        in_specs.append(pl.BlockSpec((1, S, D), lambda b: (b, 0, 0)))
    else:
        kern = _make_cross_attn_kernel(H, D, has_mask, compute_dtype)
        in_arrays += [q.astype(compute_dtype), k.astype(compute_dtype),
                      v.astype(compute_dtype)]
        in_specs += [pl.BlockSpec((1, S, D), lambda b: (b, 0, 0)),
                     pl.BlockSpec((1, S_k, D), lambda b: (b, 0, 0)),
                     pl.BlockSpec((1, S_k, D), lambda b: (b, 0, 0))]

    in_arrays += [wqkv, wo_heads, bias]
    in_specs += [wqkv_spec, wo_spec, bias_spec]

    if has_mask:
        in_arrays.append(mask.astype(jnp.bfloat16))          # narrow mask DMA
        in_specs.append(pl.BlockSpec((S, S_k), lambda b: (0, 0)))

    out = pl.pallas_call(
        kern,
        out_shape=jax.ShapeDtypeStruct((B, S, D), jnp.float32),
        grid=(B,),
        in_specs=in_specs,
        out_specs=out_spec,
        compiler_params=pltpu.CompilerParams(
            dimension_semantics=("parallel",)),
    )(*in_arrays)
    return out


# ------------------------------------------------------------------
# Pure-JAX reference (mirrors the PyTorch code) for a sanity check
# ------------------------------------------------------------------
def multi_head_reference(q, k, v, params, mask=None):
    if k is None:
        k = q
    if v is None:
        v = q
    B, S, D = q.shape
    H = params["wq"].shape[0]
    outs = []
    for h in range(H):
        qp = q @ params["wq"][h].T
        kp = k @ params["wk"][h].T
        vp = v @ params["wv"][h].T
        att = jnp.einsum("bsd,btd->bst", qp, kp) / math.sqrt(D)
        if mask is not None:
            att = jnp.where(mask[None] > 0.0, att, -jnp.inf)
        att = jax.nn.softmax(att, axis=-1)
        outs.append(jnp.einsum("bst,btd->bsd", att, vp))
    cat = jnp.concatenate(outs, axis=-1)
    return cat @ params["wo"].T + params["bo"]


def make_params(key, hidden_dim, head_num):
    ks = jax.random.split(key, 5)
    s = 0.02
    return {
        "wq": s * jax.random.normal(ks[0], (head_num, hidden_dim, hidden_dim), jnp.float32),
        "wk": s * jax.random.normal(ks[1], (head_num, hidden_dim, hidden_dim), jnp.float32),
        "wv": s * jax.random.normal(ks[2], (head_num, hidden_dim, hidden_dim), jnp.float32),
        # TODO(synk): sized to the concat width (hidden*head_num); the original
        # nn.Linear in_features only matches when head_num == 1.
        "wo": s * jax.random.normal(ks[3], (hidden_dim, head_num * hidden_dim), jnp.float32),
        "bo": s * jax.random.normal(ks[4], (hidden_dim,), jnp.float32),
    }


if __name__ == "__main__":
    batch, seq, hidden, heads = 2, 8, 32, 2

    key = jax.random.PRNGKey(0)
    k_q, k_k, k_v, k_p = jax.random.split(key, 4)
    q = jax.random.normal(k_q, (batch, seq, hidden), jnp.float32)
    params = make_params(k_p, hidden, heads)

    # 1) Self-attention, no mask (the module's default usage).
    out = multi_head_forward(q, None, None, params, mask=None)
    out = jax.block_until_ready(out)
    ref = multi_head_reference(q, None, None, params, mask=None)
    assert out.shape == (batch, seq, hidden)
    assert jnp.allclose(out, ref, atol=1e-2, rtol=1e-2), "self-attn mismatch vs reference"

    # 2) Cross-attention with an explicit (causal) mask.
    k_in = jax.random.normal(k_k, (batch, seq, hidden), jnp.float32)
    v_in = jax.random.normal(k_v, (batch, seq, hidden), jnp.float32)
    mask = jnp.tril(jnp.ones((seq, seq), jnp.float32))
    out2 = multi_head_forward(q, k_in, v_in, params, mask=mask)
    out2 = jax.block_until_ready(out2)
    ref2 = multi_head_reference(q, k_in, v_in, params, mask=mask)
    assert jnp.allclose(out2, ref2, atol=1e-2, rtol=1e-2), "masked cross-attn mismatch vs reference"

    print("KERNEL_OK")
</pallas_src>

<mosaic_0001>
module attributes {stable_mosaic.version = 11 : i64} {
  func.func @kernel(%arg0: i32, %arg1: memref<1x8x32xbf16, #tpu.memory_space<vmem>>, %arg2: memref<2x96x32xbf16, #tpu.memory_space<vmem>>, %arg3: memref<2x32x32xbf16, #tpu.memory_space<vmem>>, %arg4: memref<1x32xf32, #tpu.memory_space<vmem>>, %arg5: memref<1x8x32xf32, #tpu.memory_space<vmem>>) attributes {dimension_semantics = [#tpu.dimension_semantics<parallel>], iteration_bounds = array<i64: 2>, scalar_prefetch = 0 : i64, scratch_operands = 0 : i64, tpu.core_type = #tpu.core_type<tc>, window_params = [{transform_indices = @transform_0, window_bounds = array<i64: 1, 8, 32>}, {pipeline_mode = #tpu.pipeline_mode<synchronous>, transform_indices = @transform_1, window_bounds = array<i64: 2, 96, 32>}, {pipeline_mode = #tpu.pipeline_mode<synchronous>, transform_indices = @transform_2, window_bounds = array<i64: 2, 32, 32>}, {pipeline_mode = #tpu.pipeline_mode<synchronous>, transform_indices = @transform_3, window_bounds = array<i64: 1, 32>}, {transform_indices = @transform_4, window_bounds = array<i64: 1, 8, 32>}]} {
    %c0 = arith.constant 0 : index
    %c0_0 = arith.constant 0 : index
    %c0_1 = arith.constant 0 : index
    %0 = vector.load %arg1[%c0, %c0_0, %c0_1] : memref<1x8x32xbf16, #tpu.memory_space<vmem>>, vector<1x8x32xbf16>
    %1 = vector.shape_cast %0 : vector<1x8x32xbf16> to vector<8x32xbf16>
    %c0_2 = arith.constant 0 : index
    %c0_3 = arith.constant 0 : index
    %2 = vector.load %arg4[%c0_2, %c0_3] : memref<1x32xf32, #tpu.memory_space<vmem>>, vector<1x32xf32>
    %cst = arith.constant 0.000000e+00 : f32
    %3 = vector.broadcast %cst : f32 to vector<8x32xf32>
    %c0_4 = arith.constant 0 : index
    %c0_5 = arith.constant 0 : index
    %c0_6 = arith.constant 0 : index
    %4 = vector.load %arg2[%c0_4, %c0_5, %c0_6] : memref<2x96x32xbf16, #tpu.memory_space<vmem>>, vector<1x96x32xbf16>
    %5 = vector.shape_cast %4 : vector<1x96x32xbf16> to vector<96x32xbf16>
    %cst_7 = arith.constant dense<0.000000e+00> : vector<8x96xf32>
    %6 = tpu.matmul %1, %5, %cst_7 {dimension_numbers = #tpu.dot_dimension_numbers<[1], [1], [0], [0], [0, 0, 1, 0], [], []>} : vector<8x32xbf16>, vector<96x32xbf16>, vector<8x96xf32> -> vector<8x96xf32>
    %7 = vector.extract_strided_slice %6 {offsets = [0, 0], sizes = [8, 32], strides = [1, 1]} : vector<8x96xf32> to vector<8x32xf32>
    %cst_8 = arith.constant 0.176776692 : f32
    %8 = vector.broadcast %cst_8 : f32 to vector<8x32xf32>
    %9 = arith.mulf %7, %8 : vector<8x32xf32>
    %10 = arith.truncf %9 : vector<8x32xf32> to vector<8x32xbf16>
    %11 = vector.extract_strided_slice %6 {offsets = [0, 32], sizes = [8, 32], strides = [1, 1]} : vector<8x96xf32> to vector<8x32xf32>
    %12 = arith.truncf %11 : vector<8x32xf32> to vector<8x32xbf16>
    %13 = vector.extract_strided_slice %6 {offsets = [0, 64], sizes = [8, 32], strides = [1, 1]} : vector<8x96xf32> to vector<8x32xf32>
    %14 = arith.truncf %13 : vector<8x32xf32> to vector<8x32xbf16>
    %cst_9 = arith.constant dense<0.000000e+00> : vector<8x8xf32>
    %15 = tpu.matmul %10, %12, %cst_9 {dimension_numbers = #tpu.dot_dimension_numbers<[1], [1], [0], [0], [0, 0, 1, 0], [], []>} : vector<8x32xbf16>, vector<8x32xbf16>, vector<8x8xf32> -> vector<8x8xf32>
    %cst_10 = arith.constant dense<0xFF800000> : vector<8xf32>
    %16 = vector.multi_reduction <maximumf>, %15, %cst_10 [1] : vector<8x8xf32> to vector<8xf32>
    %17 = vector.shape_cast %16 : vector<8xf32> to vector<8x1xf32>
    %18 = vector.broadcast %17 : vector<8x1xf32> to vector<8x8xf32>
    %19 = arith.subf %15, %18 : vector<8x8xf32>
    %20 = math.exp %19 : vector<8x8xf32>
    %cst_11 = arith.constant dense<0.000000e+00> : vector<8xf32>
    %21 = vector.multi_reduction <add>, %20, %cst_11 [1] : vector<8x8xf32> to vector<8xf32>
    %22 = vector.shape_cast %21 : vector<8xf32> to vector<8x1xf32>
    %23 = arith.truncf %20 : vector<8x8xf32> to vector<8x8xbf16>
    %cst_12 = arith.constant dense<0.000000e+00> : vector<8x32xf32>
    %24 = tpu.matmul %23, %14, %cst_12 {dimension_numbers = #tpu.dot_dimension_numbers<[1], [0], [0], [1], [0, 0, 1, 1], [], []>} : vector<8x8xbf16>, vector<8x32xbf16>, vector<8x32xf32> -> vector<8x32xf32>
    %25 = tpu.reciprocal %22 {approx = true} : vector<8x1xf32> -> vector<8x1xf32>
    %26 = vector.broadcast %25 : vector<8x1xf32> to vector<8x32xf32>
    %27 = arith.mulf %24, %26 : vector<8x32xf32>
    %28 = arith.truncf %27 : vector<8x32xf32> to vector<8x32xbf16>
    %c0_13 = arith.constant 0 : index
    %c0_14 = arith.constant 0 : index
    %c0_15 = arith.constant 0 : index
    %29 = vector.load %arg3[%c0_13, %c0_14, %c0_15] : memref<2x32x32xbf16, #tpu.memory_space<vmem>>, vector<1x32x32xbf16>
    %30 = vector.shape_cast %29 : vector<1x32x32xbf16> to vector<32x32xbf16>
    %cst_16 = arith.constant dense<0.000000e+00> : vector<8x32xf32>
    %31 = tpu.matmul %28, %30, %cst_16 {dimension_numbers = #tpu.dot_dimension_numbers<[1], [1], [0], [0], [0, 0, 1, 0], [], []>} : vector<8x32xbf16>, vector<32x32xbf16>, vector<8x32xf32> -> vector<8x32xf32>
    %32 = arith.addf %3, %31 : vector<8x32xf32>
    %c1 = arith.constant 1 : index
    %c0_17 = arith.constant 0 : index
    %c0_18 = arith.constant 0 : index
    %33 = vector.load %arg2[%c1, %c0_17, %c0_18] : memref<2x96x32xbf16, #tpu.memory_space<vmem>>, vector<1x96x32xbf16>
    %34 = vector.shape_cast %33 : vector<1x96x32xbf16> to vector<96x32xbf16>
    %cst_19 = arith.constant dense<0.000000e+00> : vector<8x96xf32>
    %35 = tpu.matmul %1, %34, %cst_19 {dimension_numbers = #tpu.dot_dimension_numbers<[1], [1], [0], [0], [0, 0, 1, 0], [], []>} : vector<8x32xbf16>, vector<96x32xbf16>, vector<8x96xf32> -> vector<8x96xf32>
    %36 = vector.extract_strided_slice %35 {offsets = [0, 0], sizes = [8, 32], strides = [1, 1]} : vector<8x96xf32> to vector<8x32xf32>
    %cst_20 = arith.constant 0.176776692 : f32
    %37 = vector.broadcast %cst_20 : f32 to vector<8x32xf32>
    %38 = arith.mulf %36, %37 : vector<8x32xf32>
    %39 = arith.truncf %38 : vector<8x32xf32> to vector<8x32xbf16>
    %40 = vector.extract_strided_slice %35 {offsets = [0, 32], sizes = [8, 32], strides = [1, 1]} : vector<8x96xf32> to vector<8x32xf32>
    %41 = arith.truncf %40 : vector<8x32xf32> to vector<8x32xbf16>
    %42 = vector.extract_strided_slice %35 {offsets = [0, 64], sizes = [8, 32], strides = [1, 1]} : vector<8x96xf32> to vector<8x32xf32>
    %43 = arith.truncf %42 : vector<8x32xf32> to vector<8x32xbf16>
    %cst_21 = arith.constant dense<0.000000e+00> : vector<8x8xf32>
    %44 = tpu.matmul %39, %41, %cst_21 {dimension_numbers = #tpu.dot_dimension_numbers<[1], [1], [0], [0], [0, 0, 1, 0], [], []>} : vector<8x32xbf16>, vector<8x32xbf16>, vector<8x8xf32> -> vector<8x8xf32>
    %cst_22 = arith.constant dense<0xFF800000> : vector<8xf32>
    %45 = vector.multi_reduction <maximumf>, %44, %cst_22 [1] : vector<8x8xf32> to vector<8xf32>
    %46 = vector.shape_cast %45 : vector<8xf32> to vector<8x1xf32>
    %47 = vector.broadcast %46 : vector<8x1xf32> to vector<8x8xf32>
    %48 = arith.subf %44, %47 : vector<8x8xf32>
    %49 = math.exp %48 : vector<8x8xf32>
    %cst_23 = arith.constant dense<0.000000e+00> : vector<8xf32>
    %50 = vector.multi_reduction <add>, %49, %cst_23 [1] : vector<8x8xf32> to vector<8xf32>
    %51 = vector.shape_cast %50 : vector<8xf32> to vector<8x1xf32>
    %52 = arith.truncf %49 : vector<8x8xf32> to vector<8x8xbf16>
    %cst_24 = arith.constant dense<0.000000e+00> : vector<8x32xf32>
    %53 = tpu.matmul %52, %43, %cst_24 {dimension_numbers = #tpu.dot_dimension_numbers<[1], [0], [0], [1], [0, 0, 1, 1], [], []>} : vector<8x8xbf16>, vector<8x32xbf16>, vector<8x32xf32> -> vector<8x32xf32>
    %54 = tpu.reciprocal %51 {approx = true} : vector<8x1xf32> -> vector<8x1xf32>
    %55 = vector.broadcast %54 : vector<8x1xf32> to vector<8x32xf32>
    %56 = arith.mulf %53, %55 : vector<8x32xf32>
    %57 = arith.truncf %56 : vector<8x32xf32> to vector<8x32xbf16>
    %c1_25 = arith.constant 1 : index
    %c0_26 = arith.constant 0 : index
    %c0_27 = arith.constant 0 : index
    %58 = vector.load %arg3[%c1_25, %c0_26, %c0_27] : memref<2x32x32xbf16, #tpu.memory_space<vmem>>, vector<1x32x32xbf16>
    %59 = vector.shape_cast %58 : vector<1x32x32xbf16> to vector<32x32xbf16>
    %cst_28 = arith.constant dense<0.000000e+00> : vector<8x32xf32>
    %60 = tpu.matmul %57, %59, %cst_28 {dimension_numbers = #tpu.dot_dimension_numbers<[1], [1], [0], [0], [0, 0, 1, 0], [], []>} : vector<8x32xbf16>, vector<32x32xbf16>, vector<8x32xf32> -> vector<8x32xf32>
    %61 = arith.addf %32, %60 : vector<8x32xf32>
    %62 = vector.broadcast %2 : vector<1x32xf32> to vector<8x32xf32>
    %63 = arith.addf %61, %62 : vector<8x32xf32>
    %c0_29 = arith.constant 0 : index
    %c0_30 = arith.constant 0 : index
    %c0_31 = arith.constant 0 : index
    %64 = vector.load %arg5[%c0_29, %c0_30, %c0_31] : memref<1x8x32xf32, #tpu.memory_space<vmem>>, vector<1x8x32xf32>
    %65 = vector.shape_cast %64 : vector<1x8x32xf32> to vector<8x32xf32>
    %66 = vector.shape_cast %63 : vector<8x32xf32> to vector<1x8x32xf32>
    tpu.vector_store %arg5[%c0_29, %c0_30, %c0_31], %66 {strides = array<i32>} : memref<1x8x32xf32, #tpu.memory_space<vmem>>, vector<1x8x32xf32>,
    return
  }
  func.func @transform_0(%arg0: i32) -> (i32, i32, i32) {
    %c0_i32 = arith.constant 0 : i32
    %c0_i32_0 = arith.constant 0 : i32
    %c0_i32_1 = arith.constant 0 : i32
    return %arg0, %c0_i32, %c0_i32_0 : i32, i32, i32
  }
  func.func @transform_1(%arg0: i32) -> (i32, i32, i32) {
    %c0_i32 = arith.constant 0 : i32
    %c0_i32_0 = arith.constant 0 : i32
    %c0_i32_1 = arith.constant 0 : i32
    %c0_i32_2 = arith.constant 0 : i32
    return %c0_i32, %c0_i32_0, %c0_i32_1 : i32, i32, i32
  }
  func.func @transform_2(%arg0: i32) -> (i32, i32, i32) {
    %c0_i32 = arith.constant 0 : i32
    %c0_i32_0 = arith.constant 0 : i32
    %c0_i32_1 = arith.constant 0 : i32
    %c0_i32_2 = arith.constant 0 : i32
    return %c0_i32, %c0_i32_0, %c0_i32_1 : i32, i32, i32
  }
  func.func @transform_3(%arg0: i32) -> (i32, i32) {
    %c0_i32 = arith.constant 0 : i32
    %c0_i32_0 = arith.constant 0 : i32
    %c0_i32_1 = arith.constant 0 : i32
    return %c0_i32, %c0_i32_0 : i32, i32
  }
  func.func @transform_4(%arg0: i32) -> (i32, i32, i32) {
    %c0_i32 = arith.constant 0 : i32
    %c0_i32_0 = arith.constant 0 : i32
    %c0_i32_1 = arith.constant 0 : i32
    return %arg0, %c0_i32, %c0_i32_0 : i32, i32, i32
  }
}

</mosaic_0001>

<bundles_post_ra>
// kernel: tpu_custom_call.1
= control target key start
LH: loop header
LB: loop body
LE: loop exit
PB: predicated region body
PF: predicated region fallthrough
CT: control target
= control target key end

     0   :  { %9 = vsyncpa [#allocation3], 0  ;;  %s1377_s0 = inlined_call_operand.vmem [shape: bf16[2,8,32], index: 0, kind: input, shape index: {}]   ;;  %s1378_s1 = inlined_call_operand.vmem [shape: bf16[2,96,32], index: 1, kind: input, shape index: {}]   ;;  %s1379_s2 = inlined_call_operand.vmem [shape: bf16[2,32,32], index: 2, kind: input, shape index: {}]   ;;  %s1380_s3 = inlined_call_operand.vmem [shape: f32[1,32], index: 3, kind: input, shape index: {}]   ;;  %s1381_s4 = inlined_call_operand.hbm [shape: f32[2,8,32], index: 4, kind: output, shape index: {}]  }
   0x1   :  { %11 = vsyncpa [#allocation3 + $0x1], 0  ;;  %s1149_s15 = smov 0   ;;  %s1151_s16 = smov 0  }
   0x2   :  { %s1153_s17 = smov 0   ;;  %s1155_s18 = smov 0  }
   0x3 LB: > { %s1170_s19 = sadd.s32 4294967295, %s1117_s18   ;;  %s837_s20 = sadd.s32 4294967294, %s1117_s18   ;;  %s1117_s18 = sphi %s1155_s18, %s1387_s18   ;;  %s1113_s17 = sphi %s1153_s17, %s1386_s17   ;;  %s1109_s16 = sphi %s1151_s16, %s1385_s16   ;;  %s1105_s15 = sphi %s1149_s15, %s1384_s15  }
   0x4   : > { %s1174_s21 = sadd.s32 1, %s1117_s18   ;;  %s113_s22 = sadd.s32 1, %s1113_s17 }
   0x5   : > { %s110_s23 = ssub.s32 %s1117_s18, %s1174_s21  ;;  %p123_p0 = scmp.ne.s32.totalorder %s1113_s17, %s1109_s16 }
   0x6   : > { %p111_p1 = scmp.eq.s32.totalorder %s110_s23, 0  ;;  %p124_p2 = scmp.eq.s32.totalorder %s1170_s19, 1 }
   0x7   : > { %p129_p3 = scmp.ne.s32.totalorder %s1109_s16, %s1105_s15  ;;  %p130_p4 = scmp.eq.s32.totalorder %s837_s20, 1 }
   0x8   : > { %s1185_s24 = scalar_select %p111_p1, %s1113_s17, %s113_s22  }
   0x9   : > { %p1187_p5 = por %p124_p2, %p123_p0  ;;  %p1191_p6 = por %p130_p4, %p129_p3 }
   0xa   : > { %p840_p7 = scmp.ge.s32.totalorder %s1117_s18, 1  ;;  %p164_p8 = scmp.lt.s32.totalorder %s1117_s18, 3 }
   0xc   : > { %p165_p9 = pnand %p840_p7, %p164_p8 }
   0xd   : > { %v1031_v0 = vld [vmem:[%s1378_s1] sm:$0xff] (!%p165_p9)   ;;  %v1119_v1 = vmov (!%p165_p9), 0.0   ;;  %vm238_vm0 = vcmask (!%p165_p9), 261120   ;;  %v1032_v3 = vld [vmem:[%s1378_s1 + $0x8] sm:$0xff] (!%p165_p9)   ;;  %vm1120_vm1 = vmmov (!%p165_p9), 0   ;;  %v1033_v5 = vld [vmem:[%s1378_s1 + $0x10] sm:$0xff] (!%p165_p9)  }
   0xe   : > { %168 = sbr.rel (%p165_p9) target bundleno = 1974 (0x7b6), region = 36  ;;  %916 = vmatprep.subr.bf16.mxu0 (!%p165_p9), %v1119_v1  ;;  %932 = vmatprep.subr.bf16.mxu1 (!%p165_p9), %v1119_v1  ;;  %v243_v2 = vsel (!%p165_p9), %vm238_vm0, %v1031_v0, 0  ;;  %v246_v4 = vsel (!%p165_p9), %vm238_vm0, %v1032_v3, 0  ;;  %v249_v6 = vsel (!%p165_p9), %vm238_vm0, %v1033_v5, 0  ;;  %v1034_v7 = vld [vmem:[%s1378_s1 + $0x18] sm:$0xff] (!%p165_p9)   ;;  %v1035_v9 = vld [vmem:[%s1378_s1 + $0x20] sm:$0xff] (!%p165_p9)  }
   0xf   : > { %917 = vmatpush3.bf16.xpose.msra.mxu0 (!%p165_p9), %v243_v2  ;;  %928 = vmatprep.mubr.msk.bf16.mxu0 (!%p165_p9), %vm1120_vm1, %v1119_v1  ;;  %v252_v8 = vsel (!%p165_p9), %vm238_vm0, %v1034_v7, 0  ;;  %v255_v10 = vsel (!%p165_p9), %vm238_vm0, %v1035_v9, 0  ;;  %p189_p10 = scmp.lt.s32.totalorder (!%p165_p9), %s1170_s19, 1  ;;  %v1036_v11 = vld [vmem:[%s1378_s1 + $0x28] sm:$0xff] (!%p165_p9)   ;;  %s1121_s27 = smov (!%p165_p9), 64   ;;  %vm368_vm2 = vcmask (!%p165_p9), 1043456  }
  0x10   : > { %918 = vmatprep.subr.bf16.mxu0 (!%p165_p9), %v1119_v1  ;;  %934 = vmatprep.mubr.msk.bf16.mxu1 (!%p165_p9), %vm1120_vm1, %v1119_v1  ;;  %v258_v12 = vsel (!%p165_p9), %vm238_vm0, %v1036_v11, 0  ;;  %s1122_s28 = smov (!%p165_p9), 96   ;;  %vm352_vm3 = vcmask (!%p165_p9), 64512   ;;  %v1037_v33 = vld [vmem:[%s1378_s1 + $0x30] sm:$0xff] (!%p165_p9)   ;;  %v1038_v37 = vld [vmem:[%s1378_s1 + $0x38] sm:$0xff] (!%p165_p9)   ;;  %v1039_v39 = vld [vmem:[%s1378_s1 + $0x40] sm:$0xff] (!%p165_p9)  }
  0x11   : > { %v463_v36 = vsel (!%p165_p9), %vm238_vm0, %v1037_v33, 0  ;;  %v466_v38 = vsel (!%p165_p9), %vm238_vm0, %v1038_v37, 0  ;;  %v469_v40 = vsel (!%p165_p9), %vm238_vm0, %v1039_v39, 0  ;;  %v1040_v41 = vld [vmem:[%s1378_s1 + $0x48] sm:$0xff] (!%p165_p9)   ;;  %v1041_v43 = vld [vmem:[%s1378_s1 + $0x50] sm:$0xff] (!%p165_p9)   ;;  %v1042_v45 = vld [vmem:[%s1378_s1 + $0x58] sm:$0xff] (!%p165_p9)  }
  0x12   : > { %v472_v42 = vsel (!%p165_p9), %vm238_vm0, %v1040_v41, 0  ;;  %v475_v44 = vsel (!%p165_p9), %vm238_vm0, %v1041_v43, 0  ;;  %v478_v46 = vsel (!%p165_p9), %vm238_vm0, %v1042_v45, 0  ;;  %v1043_v5 = vld [vmem:[%s1379_s2] sm:$0xff] (!%p165_p9)   ;;  %v1044_v7 = vld [vmem:[%s1379_s2 + $0x8] sm:$0xff] (!%p165_p9)   ;;  %s186_s6 = sand.u32 (!%p165_p9), 1, %s1109_s16  }
  0x13   : > { %s841_s7 = sshll.u32 (!%p165_p9), %s186_s6, 3  ;;  %s885_s10 = sshll.u32 (!%p165_p9), %s1170_s19, 7 }
  0x14   : > { %s188_s11 = scalar_lea.vmem (!%p165_p9), [#allocation2], %s841_s7  ;;  %s1334_s20 = scalar_lea.hbm (!%p165_p9), %s1381_s4, %s885_s10 }
  0x15   : > { %s190_s13 = scalar_select %p189_p10, %s1170_s19, 1 }
  0x16   : > { %s778_s12 = sshll.u32 %s188_s11, 4  ;;  %s765_s19 = scalar_lea.sflag [#allocation3], %s186_s6  ;;  %s1336_s12 = int_to_ptr.vmem [resolvable:$true] %s778_s12 }
  0x17   : > { %919 = vmatpush3.bf16.xpose.msra.mxu0 %v246_v4  ;;  %s842_s14 = sshll.u32 %s190_s13, 2  ;;  %s1055_s22 = scalar_lea.vmem %s1336_s12, 128 }
  0x18   : > { %920 = vmatprep.subr.bf16.mxu0 %v1119_v1  ;;  %s192_s23 = scalar_lea.vmem %s1377_s0, %s842_s14  ;;  %p1056_p11 = scmp.ne.s32.totalorder %s1336_s12, %s1055_s22 }
  0x19   : > { %v1238_v13 = vld [vmem:[%s192_s23] sm:$0xf]  ;;  %s1123_s23 = smov [#allocation2]  }
  0x1a   : > { %p1057_p12 = pnand %p1056_p11, %p1187_p5 }
  0x1c   : > { %p1058_p13 = pneg %p1057_p12 }
  0x1f   : > { %921 = vmatpush3.bf16.xpose.msra.mxu0 %v249_v6  ;;  %v711_v6 = vsel %vm238_vm0, %v1043_v5, 0 }
  0x20   : > { %922 = vmatprep.subr.bf16.mxu0 %v1119_v1 }
  0x27   : > { %923 = vmatpush3.bf16.xpose.msra.mxu0 %v252_v8  ;;  %v714_v8 = vsel %vm238_vm0, %v1044_v7, 0 }
  0x28   : > { %924 = vmatprep.subr.bf16.mxu0 %v1119_v1 }
  0x2f   : > { %925 = vmatpush3.bf16.xpose.msra.mxu0 %v255_v10 }
  0x30   : > { %926 = vmatprep.subr.bf16.mxu0 %v1119_v1 }
  0x37   : > { %927 = vmatpush3.bf16.xpose.msra.mxu0 %v258_v12 }
  0x38   : > { %960 = vmatprep.subr.bf16.mxu0 %v1119_v1 }
  0x3e   : > { %929 = vmatmul.mubr.msk.bf16.vlgmr.msra.gmra.mrb[0].mxu0 %vm238_vm0, %v1238_v13 }
  0x3f   : > { %962 = vmatprep.mubr.msk.bf16.mxu0 %vm1120_vm1, %v1119_v1 }
 0x111   : > { %v294_v14 = vpop.f32.mrb[0].mxu0 }
 0x112   : > { %v930_v15 = vpop.f32.mrb[1].mxu0  ;;  %v302_v16 = vpack.c.bf16 %v294_v14, %v294_v14  ;;  %v300_v21 = vmul.f32 0.17677669, %v294_v14 }
 0x113   : > { %v297_v17 = vpop.f32.mrb[2].mxu0 }
 0x114   : > { %363 = vrot.lane.b32.xlu1 %v302_v16, %s1121_s27  ;;  %304 = vrot.lane.b32.xlu0 %v302_v16, %s1122_s28  ;;  %v931_v18 = vpop.f32.mrb[3].mxu0  ;;  %v301_v23 = vpack.c.bf16 %v300_v21, %v300_v21  ;;  %v1046_v21 = vld [vmem:[%s1379_s2 + $0x18] sm:$0xff]  }
 0x186   : > { %v305_v19 = vpop.permute.xlu0 %304  ;;  %v364_v22 = vpop.permute.xlu1 %363 }
 0x187   : > { %v310_v20 = vsel %vm238_vm0, %v305_v19, 0  ;;  %v370_v24 = vsel %vm368_vm2, %v364_v22, 0  ;;  %v1045_v19 = vld [vmem:[%s1379_s2 + $0x10] sm:$0xff]   ;;  %v655_v22 = vsel %vm238_vm0, %v1046_v21, 0 }
 0x188   : > { %933 = vmatpush3.bf16.xpose.msra.mxu1 %v310_v20  ;;  %v652_v20 = vsel %vm238_vm0, %v1045_v19, 0 }
 0x189   : > { %938 = vmatprep.subr.bf16.mxu1 %v1119_v1 }
 0x18f   : > { %935 = vmatmul.mubr.msk.bf16.vlgmr.msra.gmra.mrb[0].mxu1 %vm238_vm0, %v301_v23 }
 0x190   : > { %939 = vmatpush3.bf16.msra.mxu1 %v370_v24  ;;  %940 = vmatprep.mubr.msk.bf16.mxu1 %vm1120_vm1, %v1119_v1 }
 0x191   : > { %944 = vmatprep.subr.bf16.mxu1 %v1119_v1 }
 0x262   : > { %v346_v25 = vpop.f32.mrb[0].mxu1 }
 0x263   : > { %v936_v26 = vpop.f32.mrb[1].mxu1  ;;  %v353_v27 = vsel %vm352_vm3, %v346_v25, -inf }
 0x264   : > { %354 = vmax.xlane.f32.xlu0 %v353_v27  ;;  %v349_v28 = vpop.f32.mrb[2].mxu1 }
 0x265   : > { %v937_v29 = vpop.f32.mrb[3].mxu1 }
 0x2f1   : > { %v355_v30 = vpop.xlane.xlu0 %354 }
 0x2f2   : > { %v356_v31 = vsub.f32 %v346_v25, %v355_v30 }
 0x2f4   : > { %v357_v32 = vmul.f32 1.442695, %v356_v31 }
 0x2f6   : > { %1047 = vpow2.f32 %v357_v32 }
 0x300   : > { %v1048_v34 = vpop.eup %1047 }
 0x301   : > { %v362_v35 = vpack.c.bf16 %v1048_v34, %v1048_v34  ;;  %v359_v4 = vsel %vm352_vm3, %v1048_v34, 0.0  ;;  %v883_v34 = vld [vmem:[%s1380_s3] ss:$0 sm:$0xff] }
 0x303   : > { %941 = vmatmul.mubr.msk.bf16.vlgmr.msra.gmra.mrb[4].mxu1 %vm352_vm3, %v362_v35 }
 0x304   : > { %945 = vmatpush3.bf16.xpose.msra.mxu1 %v463_v36  ;;  %956 = vmatprep.mubr.msk.bf16.mxu1 %vm1120_vm1, %v1119_v1 }
 0x305   : > { %946 = vmatprep.subr.bf16.mxu1 %v1119_v1 }
 0x30c   : > { %947 = vmatpush3.bf16.xpose.msra.mxu1 %v466_v38 }
 0x30d   : > { %948 = vmatprep.subr.bf16.mxu1 %v1119_v1 }
 0x314   : > { %949 = vmatpush3.bf16.xpose.msra.mxu1 %v469_v40 }
 0x315   : > { %950 = vmatprep.subr.bf16.mxu1 %v1119_v1 }
 0x31c   : > { %951 = vmatpush3.bf16.xpose.msra.mxu1 %v472_v42 }
 0x31d   : > { %952 = vmatprep.subr.bf16.mxu1 %v1119_v1 }
 0x324   : > { %953 = vmatpush3.bf16.xpose.msra.mxu1 %v475_v44 }
 0x325   : > { %954 = vmatprep.subr.bf16.mxu1 %v1119_v1 }
 0x32c   : > { %955 = vmatpush3.bf16.xpose.msra.mxu1 %v478_v46 }
 0x32d   : > { %980 = vmatprep.subr.bf16.mxu1 %v1119_v1 }
 0x333   : > { %957 = vmatmul.mubr.msk.bf16.vlgmr.msra.gmra.mrb[8].mxu1 %vm238_vm0, %v1238_v13 }
 0x334   : > { %984 = vmatprep.mubr.msk.bf16.mxu1 %vm1120_vm1, %v1119_v1  ;;  %981 = vmatpush3.bf16.xpose.msra.mxu1 %v711_v6 }
 0x335   : > { %982 = vmatprep.subr.bf16.mxu1 %v1119_v1 }
 0x33c   : > { %983 = vmatpush3.bf16.xpose.msra.mxu1 %v714_v8 }
 0x3d6   : > { %v406_v47 = vpop.f32.mrb[4].mxu1 }
 0x3d7   : > { %v942_v48 = vpop.f32.mrb[5].mxu1 }
 0x3d8   : > { %v409_v49 = vpop.f32.mrb[6].mxu1 }
 0x3d9   : > { %v943_v50 = vpop.f32.mrb[7].mxu1 }
 0x406   : > { %v514_v51 = vpop.f32.mrb[8].mxu1 }
 0x407   : > { %v522_v52 = vpack.c.bf16 %v514_v51, %v514_v51  ;;  %v958_v53 = vpop.f32.mrb[9].mxu1  ;;  %v520_v58 = vmul.f32 0.17677669, %v514_v51 }
 0x408   : > { %v517_v54 = vpop.f32.mrb[10].mxu1 }
 0x409   : > { %582 = vrot.lane.b32.xlu0 %v522_v52, %s1121_s27  ;;  %524 = vrot.lane.b32.xlu1 %v522_v52, %s1122_s28  ;;  %v959_v55 = vpop.f32.mrb[11].mxu1  ;;  %v521_v60 = vpack.c.bf16 %v520_v58, %v520_v58  ;;  %s1059_s27 = sshll.u32 %s1123_s23, 4  ;;  %s1060_s27 = int_to_ptr.vmem [resolvable:$false] %s1059_s27 }
 0x40a   : > { %s1061_s28 = scalar_lea.vmem %s1060_s27, 256  ;;  %p1062_p0 = scmp.lt.s32.totalorder %s1336_s12, %s1060_s27 }
 0x40b   : > { %p1063_p1 = scmp.lt.s32.totalorder %s1061_s28, %s1055_s22 }
 0x40d   : > { %p1064_p2 = por %p1063_p1, %p1062_p0 }
 0x40f   : > { %p1065_p3 = pnand %p1064_p2, %p1058_p13 }
 0x47b   : > { %v525_v56 = vpop.permute.xlu1 %524  ;;  %v583_v59 = vpop.permute.xlu0 %582 }
 0x47c   : > { %v530_v57 = vsel %vm238_vm0, %v525_v56, 0  ;;  %v588_v61 = vsel %vm368_vm2, %v583_v59, 0 }
 0x47d   : > { %961 = vmatpush3.bf16.xpose.msra.mxu0 %v530_v57 }
 0x47e   : > { %966 = vmatprep.subr.bf16.mxu0 %v1119_v1 }
 0x484   : > { %963 = vmatmul.mubr.msk.bf16.vlgmr.msra.gmra.mrb[4].mxu0 %vm238_vm0, %v521_v60 }
 0x485   : > { %967 = vmatpush3.bf16.msra.mxu0 %v588_v61  ;;  %968 = vmatprep.mubr.msk.bf16.mxu0 %vm1120_vm1, %v1119_v1 }
 0x486   : > { %972 = vmatprep.subr.bf16.mxu0 %v1119_v1 }
 0x557   : > { %v566_v62 = vpop.f32.mrb[4].mxu0 }
 0x558   : > { %v964_v63 = vpop.f32.mrb[5].mxu0  ;;  %v572_v0 = vsel %vm352_vm3, %v566_v62, -inf }
 0x559   : > { %573 = vmax.xlane.f32.xlu1 %v572_v0  ;;  %v569_v2 = vpop.f32.mrb[6].mxu0 }
 0x55a   : > { %v965_v3 = vpop.f32.mrb[7].mxu0 }
 0x55d   : > { %360 = vadd.xlane.f32.xlu1 %v359_v4 }
 0x5e6   : > { %v574_v9 = vpop.xlane.xlu1 %573 }
 0x5e7   : > { %v575_v10 = vsub.f32 %v566_v62, %v574_v9 }
 0x5e9   : > { %v576_v11 = vmul.f32 1.442695, %v575_v10 }
 0x5ea   : > { %v361_v12 = vpop.xlane.xlu1 %360 }
 0x5eb   : > { %1049 = vpow2.f32 %v576_v11 }
 0x5ec   : > { %1051 = vrcp.f32 %v361_v12 }
 0x5f5   : > { %v1050_v13 = vpop.eup %1049 }
 0x5f6   : > { %v1052_v14 = vpop.eup %1051  ;;  %v578_v15 = vsel %vm352_vm3, %v1050_v13, 0.0  ;;  %v581_v16 = vpack.c.bf16 %v1050_v13, %v1050_v13 }
 0x5f7   : > { %v413_v17 = vmul.f32 %v1052_v14, %v406_v47  ;;  %579 = vadd.xlane.f32.xlu1 %v578_v15 }
 0x5f8   : > { %969 = vmatmul.mubr.msk.bf16.vlgmr.msra.gmra.mrb[8].mxu0 %vm352_vm3, %v581_v16 }
 0x5f9   : > { %v414_v18 = vpack.c.bf16 %v413_v17, %v413_v17  ;;  %976 = vmatprep.mubr.msk.bf16.mxu0 %vm1120_vm1, %v1119_v1  ;;  %973 = vmatpush3.bf16.xpose.msra.mxu0 %v652_v20 }
 0x5fa   : > { %974 = vmatprep.subr.bf16.mxu0 %v1119_v1 }
 0x5fb   : > { %985 = vmatmul.mubr.msk.bf16.vlgmr.msra.gmra.mrb[12].mxu1 %vm238_vm0, %v414_v18 }
 0x601   : > { %975 = vmatpush3.bf16.xpose.msra.mxu0 %v655_v22 }
 0x684   : > { %v580_v23 = vpop.xlane.xlu1 %579 }
 0x685   : > { %1053 = vrcp.f32 %v580_v23 }
 0x68f   : > { %v1054_v24 = vpop.eup %1053 }
 0x6cb   : > { %v624_v25 = vpop.f32.mrb[8].mxu0 }
 0x6cc   : > { %v631_v26 = vmul.f32 %v1054_v24, %v624_v25  ;;  %v970_v27 = vpop.f32.mrb[9].mxu0 }
 0x6cd   : > { %v627_v28 = vpop.f32.mrb[10].mxu0 }
 0x6ce   : > { %v632_v29 = vpack.c.bf16 %v631_v26, %v631_v26  ;;  %v750_v30 = vpop.f32.mrb[12].mxu1  ;;  %v971_v31 = vpop.f32.mrb[11].mxu0 }
 0x6cf   : > { %v986_v1 = vpop.f32.mrb[13].mxu1 }
 0x6d0   : > { %v753_v32 = vpop.f32.mrb[14].mxu1  ;;  %977 = vmatmul.mubr.msk.bf16.vlgmr.msra.gmra.mrb[12].mxu0 %vm238_vm0, %v632_v29 }
 0x6d1   : > { %v987_v33 = vpop.f32.mrb[15].mxu1 }
 0x7a3   : > { %v691_v35 = vpop.f32.mrb[12].mxu0 }
 0x7a4   : > { %v751_v36 = vadd.f32 %v750_v30, %v691_v35  ;;  %v978_v37 = vpop.f32.mrb[13].mxu0 }
 0x7a5   : > { %v694_v38 = vpop.f32.mrb[14].mxu0 }
 0x7a6   : > { %v762_v39 = vadd.f32 %v883_v34, %v751_v36  ;;  %v979_v40 = vpop.f32.mrb[15].mxu0 }
 0x7a8   : > { %763 = vst.msk [vmem:[%s188_s11] sm:$0xff] %vm238_vm0, %v762_v39 }
 0x7a9   : > { %1068 = shalt.err (!%p1065_p3)
}
 0x7aa   : > { %s1069_s29 = scalar_lea.hbm %s1334_s20, 128  ;;  %s1073_s6 = scalar_lea.hbm %s1381_s4, 256 }
 0x7ab   : > { %p1070_p4 = scmp.ne.s32.totalorder %s1334_s20, %s1069_s29  ;;  %p1074_p9 = scmp.lt.u32.totalorder %s1334_s20, %s1381_s4 }
 0x7ac   : > { %p1075_p10 = scmp.lt.u32.totalorder %s1073_s6, %s1069_s29  ;;  %p1077_p12 = scmp.lt.u32.totalorder %s1069_s29, %s1334_s20 }
 0x7ad   : > { %p1071_p7 = pnand %p1070_p4, %p1187_p5 }
 0x7ae   : > { %p1076_p11 = por %p1075_p10, %p1074_p9 }
 0x7af   : > { %p1072_p8 = pneg %p1071_p7 }
 0x7b0   : > { %p1078_p13 = por %p1077_p12, %p1076_p11 }
 0x7b2   : > { %p1079_p0 = pnand %p1078_p13, %p1072_p8 }
 0x7b4   : > { %1082 = shalt.err (!%p1079_p0)
}
 0x7b5   : > { %988 = dma.vmem_to_hbm [thread:$0]  (%p1187_p5), %s1336_s12, 128, %s1334_s20, %s765_s19  }
 0x7b6 PF: > { %p994_p1 = scmp.ge.s32.totalorder %s1117_s18, 2  ;;  %s790_s9 = sand.u32 1, %s1105_s15  }
 0x7b7   : > { %s791_s10 = scalar_lea.sflag [#allocation3], %s790_s9 }
 0x7b8   : > { %p991_p2 = pnand %p994_p1, %p1191_p6 }
 0x7ba   : > { %1100 = dma.done.wait (!%p991_p2), %s791_s10, 128  }
 0x7bb   : > { %1102 = vsyncadd (!%p991_p2), %s791_s10, 4294967168  ;;  %p14_p3 = scmp.ge.s32.totalorder %s1174_s21, 4   ;;  %s1384_s15 = smov %s1109_s16 }
 0x7bc   : > { %s1385_s16 = smov %s1113_s17  ;;  %s1386_s17 = smov %s1185_s24 }
 0x7bd   : > { %s1387_s18 = smov %s1174_s21  ;;  %16 = sbr.rel (!%p14_p3) target bundleno = 3 (0x3), region = 73 }
 0x7c4   :  { %796 = vsyncpa [#allocation3], 1 }
 0x7c5   :  { %798 = vsyncpa [#allocation3 + $0x1], 1 }

</bundles_post_ra>
